<compile_context>
chip_gen: v5e
topology: v5e:2x2
jax: 0.10.0
libtpu: 0.0.40
codegen_flags: <defaults>
</compile_context>

<pallas_src>
import jax
import jax.numpy as jnp
from jax.experimental import pallas as pl
from jax.experimental.pallas import tpu as pltpu


def _levelfuse_kernel(c_ref, x_ref, o_ref):
    # Elementwise fuse: out = c + x (VPU; kernel is HBM-bandwidth bound).
    o_ref[...] = c_ref[...] + x_ref[...]


def _round_up(v, m):
    return ((v + m - 1) // m) * m


_LANE_CANDIDATES = (1024, 512, 256, 128)   # multiples of 128 -> unmasked vst
_DEFAULT_TARGET_BLOCK_BYTES = 4 << 20      # ~4 MiB/buffer; 6 buffers = 24 MiB VMEM
_VMEM_LIMIT_BYTES = 32 << 20               # explicit scoped-VMEM limit (all gens OK)
_MIN_PALLAS_BYTES = 512 * 1024             # below this, plain XLA add wins


def level_fuse(c, x, *, donate_c=False,
               min_pallas_bytes=_MIN_PALLAS_BYTES,
               target_block_bytes=_DEFAULT_TARGET_BLOCK_BYTES):
    """Pallas implementation of LevelFuse.forward(c, x) == c + x."""
    assert c.shape == x.shape and c.dtype == x.dtype
    total = int(c.size)
    if total == 0:
        return c + x

    itemsize = jnp.dtype(c.dtype).itemsize
    nbytes = total * itemsize

    # Small-input fast path: pallas_call launch + plumbing dwarfs the work, and
    # the XLA add is already at roofline (and can fuse with neighbors).
    if nbytes < min_pallas_bytes:
        return c + x

    # Zero-copy lane-dense layout: largest lane width (multiple of 128) that
    # divides the flat element count.
    lane = next((l for l in _LANE_CANDIDATES if total % l == 0), None)
    if lane is None or itemsize not in (1, 2, 4):
        # TODO(synk): totals not divisible by 128 (and sub-byte / 8-byte dtypes)
        # take the XLA path; kernelizing them needs pad/slice copies that cost
        # more HBM traffic than the kernel saves.
        return c + x

    sub_mult = max(8, 32 // itemsize)       # 8 (f32/i32) / 16 (bf16) / 32 (int8)
    rows = total // lane
    row_bytes = lane * itemsize

    # Byte-capped block: ~target_block_bytes per buffer, (8,128)-aligned rows.
    block_rows = max(sub_mult,
                     (max(1, target_block_bytes // row_bytes) // sub_mult) * sub_mult)
    if block_rows >= rows:
        block_rows = rows                   # full-extent block: always legal
        num_blocks = 1
    else:
        num_blocks = pl.cdiv(rows, block_rows)
        if num_blocks % 2 == 1:
            # Prefer an even step count so v7x's two TensorCores stay balanced;
            # costs at most one extra ~0.35 us step on single-core chips.
            cand = max(sub_mult, _round_up(pl.cdiv(rows, num_blocks + 1), sub_mult))
            if pl.cdiv(rows, cand) % 2 == 0:
                block_rows = cand
                num_blocks = pl.cdiv(rows, block_rows)

    c2 = c.reshape(rows, lane)
    x2 = x.reshape(rows, lane)
    spec = pl.BlockSpec((block_rows, lane), lambda i: (i, 0))

    extra = {}
    if donate_c:
        # Opt-in only: caller guarantees `c` is dead after the call.
        # Cuts HBM traffic 3x -> 2x; default stays out-of-place like the module.
        extra["input_output_aliases"] = {0: 0}

    out2 = pl.pallas_call(
        _levelfuse_kernel,
        out_shape=jax.ShapeDtypeStruct((rows, lane), c.dtype),
        grid=(num_blocks,),
        in_specs=[spec, spec],
        out_specs=spec,
        compiler_params=pltpu.CompilerParams(
            dimension_semantics=("parallel",),
            vmem_limit_bytes=_VMEM_LIMIT_BYTES,
        ),
        cost_estimate=pl.CostEstimate(
            flops=total,
            transcendentals=0,
            bytes_accessed=3 * nbytes,
        ),
        **extra,
    )(c2, x2)

    return out2.reshape(c.shape)


if __name__ == "__main__":
    # LevelFuse(in_ch) has no parameters (in_ch unused); nothing to initialize.
    key = jax.random.PRNGKey(0)
    ks = jax.random.split(key, 8)

    # 1) Module's NCHW shape, forced through the Pallas path
    #    (lane=1024, rows=2, single full-extent block).
    N, C, H, W = 2, 4, 16, 16
    c = jax.random.normal(ks[0], (N, C, H, W), dtype=jnp.float32)
    x = jax.random.normal(ks[1], (N, C, H, W), dtype=jnp.float32)
    out = jax.block_until_ready(level_fuse(c, x, min_pallas_bytes=0))
    ref = c + x
    assert out.shape == ref.shape and out.dtype == ref.dtype
    assert jnp.allclose(out, ref, atol=1e-6, rtol=1e-6)

    # 2) Multi-block grid with a partial (masked) last block:
    #    12 rows of 1024, block_rows capped to 8 -> grid=(2,).
    c2 = jax.random.normal(ks[2], (2, 4, 32, 48), dtype=jnp.float32)
    x2 = jax.random.normal(ks[3], (2, 4, 32, 48), dtype=jnp.float32)
    out2 = jax.block_until_ready(
        level_fuse(c2, x2, min_pallas_bytes=0, target_block_bytes=8 * 1024 * 4))
    assert jnp.allclose(out2, c2 + x2, atol=1e-6, rtol=1e-6)

    # 3) Narrower lane width (total divisible by 512 but not 1024).
    c3 = jax.random.normal(ks[4], (2, 3, 16, 16), dtype=jnp.float32)
    x3 = jax.random.normal(ks[5], (2, 3, 16, 16), dtype=jnp.float32)
    out3 = jax.block_until_ready(level_fuse(c3, x3, min_pallas_bytes=0))
    assert jnp.allclose(out3, c3 + x3, atol=1e-6, rtol=1e-6)

    # 4) Odd total / tiny input -> XLA fast-path / fallback.
    c4 = jax.random.normal(ks[6], (2, 3, 7, 5), dtype=jnp.float32)
    x4 = jax.random.normal(ks[7], (2, 3, 7, 5), dtype=jnp.float32)
    out4 = jax.block_until_ready(level_fuse(c4, x4))
    assert jnp.allclose(out4, c4 + x4, atol=1e-6, rtol=1e-6)

    print("KERNEL_OK")
</pallas_src>

<mosaic_0001>
module attributes {stable_mosaic.version = 11 : i64} {
  func.func @_levelfuse_kernel(%arg0: i32, %arg1: memref<2x1024xf32, #tpu.memory_space<vmem>>, %arg2: memref<2x1024xf32, #tpu.memory_space<vmem>>, %arg3: memref<2x1024xf32, #tpu.memory_space<vmem>>) attributes {dimension_semantics = [#tpu.dimension_semantics<parallel>], iteration_bounds = array<i64: 1>, scalar_prefetch = 0 : i64, scratch_operands = 0 : i64, tpu.core_type = #tpu.core_type<tc>, window_params = [{transform_indices = @transform_0, window_bounds = array<i64: 2, 1024>}, {transform_indices = @transform_1, window_bounds = array<i64: 2, 1024>}, {transform_indices = @transform_2, window_bounds = array<i64: 2, 1024>}]} {
    %c0 = arith.constant 0 : index
    %c0_0 = arith.constant 0 : index
    %0 = vector.load %arg1[%c0, %c0_0] : memref<2x1024xf32, #tpu.memory_space<vmem>>, vector<2x1024xf32>
    %c0_1 = arith.constant 0 : index
    %c0_2 = arith.constant 0 : index
    %1 = vector.load %arg2[%c0_1, %c0_2] : memref<2x1024xf32, #tpu.memory_space<vmem>>, vector<2x1024xf32>
    %2 = arith.addf %0, %1 : vector<2x1024xf32>
    %c0_3 = arith.constant 0 : index
    %c0_4 = arith.constant 0 : index
    %3 = vector.load %arg3[%c0_3, %c0_4] : memref<2x1024xf32, #tpu.memory_space<vmem>>, vector<2x1024xf32>
    tpu.vector_store %arg3[%c0_3, %c0_4], %2 {strides = array<i32>} : memref<2x1024xf32, #tpu.memory_space<vmem>>, vector<2x1024xf32>,
    return
  }
  func.func @transform_0(%arg0: i32) -> (i32, i32) {
    %c0_i32 = arith.constant 0 : i32
    %c0_i32_0 = arith.constant 0 : i32
    return %arg0, %c0_i32 : i32, i32
  }
  func.func @transform_1(%arg0: i32) -> (i32, i32) {
    %c0_i32 = arith.constant 0 : i32
    %c0_i32_0 = arith.constant 0 : i32
    return %arg0, %c0_i32 : i32, i32
  }
  func.func @transform_2(%arg0: i32) -> (i32, i32) {
    %c0_i32 = arith.constant 0 : i32
    %c0_i32_0 = arith.constant 0 : i32
    return %arg0, %c0_i32 : i32, i32
  }
}

</mosaic_0001>

<bundles_post_ra>
// kernel: tpu_custom_call.1
= control target key start
LH: loop header
LB: loop body
LE: loop exit
PB: predicated region body
PF: predicated region fallthrough
CT: control target
= control target key end

     0   :  { %7 = vsyncpa [#allocation3], 0  ;;  %s174_s0 = inlined_call_operand.hbm [shape: f32[2,1024], index: 0, kind: input, shape index: {}]   ;;  %s175_s1 = inlined_call_operand.hbm [shape: f32[2,1024], index: 1, kind: input, shape index: {}]   ;;  %s176_s2 = inlined_call_operand.hbm [shape: f32[2,1024], index: 2, kind: output, shape index: {}]  }
   0x1   :  { %8 = vsyncpa [#allocation6], 0 }
   0x2   :  { %9 = vsyncpa [#allocation4], 0  ;;  %s15_s11 = sshll.u32 %s174_s0, 4  ;;  %s147_s12 = smov [#allocation2]   ;;  %s16_s11 = int_to_ptr.hbm [resolvable:$true] %s15_s11 }
   0x3   :  { %s17_s13 = sshll.u32 %s147_s12, 4  ;;  %s26_s16 = sshll.u32 %s175_s1, 4  ;;  %s18_s13 = int_to_ptr.vmem [resolvable:$true] %s17_s13  ;;  %s27_s16 = int_to_ptr.hbm [resolvable:$true] %s26_s16 }
   0x4   :  { %20 = dma.hbm_to_vmem [thread:$0]  %s16_s11, 256, %s18_s13, [#allocation3]  }
   0x5   :  { %s148_s17 = smov [#allocation5]  }
   0x6   :  { %s28_s18 = sshll.u32 %s148_s17, 4  ;;  %s29_s18 = int_to_ptr.vmem [resolvable:$true] %s28_s18 }
   0x7   :  { %31 = dma.hbm_to_vmem [thread:$0]  %s27_s16, 256, %s29_s18, [#allocation6]  }
   0x8   :  { %141 = dma.done.wait [#allocation3], 256  }
   0x9   :  { %142 = vsyncadd [#allocation3], 4294967040 }
   0xa   :  { %143 = dma.done.wait [#allocation6], 256  }
   0xb   :  { %144 = vsyncadd [#allocation6], 4294967040  ;;  %s149_s19 = smov [#allocation7]   ;;  %s55_s22 = sshll.u32 %s176_s2, 4  ;;  %v40_v0 = vld [vmem:[#allocation2] sm:$0xff]  ;;  %v42_v1 = vld [vmem:[#allocation5] sm:$0xff]  ;;  %s56_s22 = int_to_ptr.hbm [resolvable:$true] %s55_s22 }
   0xc   :  { %s53_s0 = sshll.u32 %s149_s19, 4  ;;  %v41_v2 = vld [vmem:[#allocation2 + $0x8] sm:$0xff]  ;;  %v44_v3 = vadd.f32 %v42_v1, %v40_v0  ;;  %v43_v4 = vld [vmem:[#allocation5 + $0x8] sm:$0xff]  ;;  %s54_s0 = int_to_ptr.vmem [resolvable:$true] %s53_s0 }
   0xd   :  { %v45_v5 = vadd.f32 %v43_v4, %v41_v2 }
   0xe   :  { %46 = vst [vmem:[#allocation7] sm:$0xff] %v44_v3 }
   0xf   :  { %47 = vst [vmem:[#allocation7 + $0x8] sm:$0xff] %v45_v5 }
  0x10   :  { %58 = dma.vmem_to_hbm [thread:$0]  %s54_s0, 256, %s56_s22, [#allocation4]  }
  0x11   :  { %145 = dma.done.wait [#allocation4], 256  }
  0x12   :  { %146 = vsyncadd [#allocation4], 4294967040 }
  0x13   :  { %63 = vsyncpa [#allocation3], 1 }
  0x14   :  { %64 = vsyncpa [#allocation6], 1 }
  0x15   :  { %65 = vsyncpa [#allocation4], 1 }

</bundles_post_ra>
